<compile_context>
chip_gen: v6e
topology: v6e:2x2x1
jax: 0.10.0
libtpu: 0.0.40
codegen_flags: <defaults>
</compile_context>

<pallas_src>
import math

import jax
import jax.numpy as jnp
from jax.experimental import pallas as pl
from jax.experimental.pallas import tpu as pltpu


def _build_pe(feature_dim: int) -> jnp.ndarray:
    """Buffer construction mirroring the PyTorch __init__ EXACTLY.

    Note: the reference module is deliberately reproduced verbatim even though
    it is not the canonical Transformer PE (div_term uses arange(0, D//2),
    'position' indexes the feature axis, cos uses odd feature indices).
    """
    assert feature_dim % 2 == 0, "feature_dim must be even (matches PyTorch module)"
    position = jnp.arange(0, feature_dim, dtype=jnp.float32)[None, :]            # (1, D)
    div_term = jnp.exp(
        jnp.arange(0, feature_dim // 2, dtype=jnp.float32)
        * (-math.log(10000.0) / feature_dim)
    )                                                                             # (D//2,)
    pe = jnp.zeros((1, feature_dim), dtype=jnp.float32)
    pe = pe.at[0, 0::2].set(jnp.sin(position[:, 0::2] * div_term)[0])
    pe = pe.at[0, 1::2].set(jnp.cos(position[:, 1::2] * div_term)[0])
    return pe


def _make_add_pe_kernel(nd: int):
    """Kernel body; pe is fully resident (1, D2) and sliced only when nd > 1."""

    def kernel(x_ref, pe_ref, o_ref):
        td = x_ref.shape[-1]
        if nd == 1:
            pe_tile = pe_ref[...]                                   # (1, D2) == (1, td)
        else:
            off = pl.multiple_of(pl.program_id(1) * td, 128)        # 128-aligned lane offset
            pe_tile = pe_ref[:, pl.ds(off, td)]
        o_ref[...] = (x_ref[...] + pe_tile).astype(o_ref.dtype)

    return kernel


def _choose_tile(total: int, unit: int, max_tile: int) -> int:
    """Largest legal tile: full extent if it fits, else a multiple of `unit`."""
    if total <= max_tile:
        return total
    return max((max_tile // unit) * unit, unit)


def positional_encoding(x: jnp.ndarray, pe: jnp.ndarray) -> jnp.ndarray:
    """x: (B, D), pe: (1, D) -> (B, D), computing x + pe with a tiled Pallas kernel."""
    B, D = x.shape
    assert pe.shape == (1, D)
    itemsize = jnp.dtype(x.dtype).itemsize

    # ---- Lane-dense repack + row padding (layout plumbing only) -------------
    x2 = x
    pe2 = pe.astype(x.dtype)
    pad_rows = 0
    repacked = False
    if D % 128 != 0:
        k = 128 // math.gcd(D, 128)              # smallest k with (k * D) % 128 == 0
        pad_rows = (-B) % k
        if pad_rows:
            x2 = jnp.pad(x2, ((0, pad_rows), (0, 0)))   # few extra rows beat masked stores
        x2 = x2.reshape((B + pad_rows) // k, k * D)     # k consecutive rows per packed row
        pe2 = jnp.tile(pe2, (1, k))                     # pe repeated to match packing
        repacked = True
    B2, D2 = x2.shape                                   # D2 is always a multiple of 128

    # ---- Tile selection ------------------------------------------------------
    sub_unit = max(8, 32 // itemsize)            # dtype-aware sublane unit: f32->8, bf16->16, i8->32
    tile_d = _choose_tile(D2, 128, 16384)        # wide lane tiles; nd == 1 is the common case
    target_tile_bytes = 4 * 1024 * 1024          # ~4 MiB x-tile; 2x(x)+2x(out) << 48 MiB limit
    max_rows = max(sub_unit, target_tile_bytes // max(1, tile_d * itemsize))
    tile_b = _choose_tile(B2, sub_unit, max_rows)

    nb = pl.cdiv(B2, tile_b)                     # leading, large, megacore-sharded axis
    nd = pl.cdiv(D2, tile_d)

    cost = pl.CostEstimate(
        flops=B2 * D2,
        transcendentals=0,
        bytes_accessed=2 * B2 * D2 * itemsize + D2 * itemsize,
    )

    out2 = pl.pallas_call(
        _make_add_pe_kernel(nd),
        out_shape=jax.ShapeDtypeStruct((B2, D2), x.dtype),
        grid=(nb, nd),                           # row axis leading -> both v7x TCs split rows
        in_specs=[
            pl.BlockSpec((tile_b, tile_d), lambda i, j: (i, j)),
            # Full pe stays resident in VMEM for the whole grid (constant block index).
            pl.BlockSpec((1, D2), lambda i, j: (0, 0)),
        ],
        out_specs=pl.BlockSpec((tile_b, tile_d), lambda i, j: (i, j)),
        compiler_params=pltpu.CompilerParams(
            dimension_semantics=("parallel", "parallel"),
            vmem_limit_bytes=48 * 1024 * 1024,
        ),
        cost_estimate=cost,
    )(x2, pe2)

    if repacked:
        out = out2.reshape(B + pad_rows, D)
        return out[:B] if pad_rows else out
    return out2


if __name__ == "__main__":
    feature_dim = 32
    batch = 8

    keys = jax.random.split(jax.random.PRNGKey(0), 3)
    pe = _build_pe(feature_dim)

    # Main demo shape (B=8, D=32): lane-dense repack, no padding needed.
    x = jax.random.normal(keys[0], (batch, feature_dim), dtype=jnp.float32)
    out = jax.block_until_ready(positional_encoding(x, pe))
    assert out.shape == (batch, feature_dim)
    assert jnp.allclose(out, x + pe, atol=1e-6), "mismatch vs reference (8, 32)"

    # Exercise the row-padding path (B=7 not a multiple of the repack factor k=4).
    x_odd = jax.random.normal(keys[1], (7, feature_dim), dtype=jnp.float32)
    out_odd = jax.block_until_ready(positional_encoding(x_odd, pe))
    assert out_odd.shape == (7, feature_dim)
    assert jnp.allclose(out_odd, x_odd + pe, atol=1e-6), "mismatch vs reference (7, 32)"

    # Exercise the no-repack path (D already a multiple of 128).
    pe_wide = _build_pe(128)
    x_wide = jax.random.normal(keys[2], (16, 128), dtype=jnp.float32)
    out_wide = jax.block_until_ready(positional_encoding(x_wide, pe_wide))
    assert jnp.allclose(out_wide, x_wide + pe_wide, atol=1e-6), "mismatch vs reference (16, 128)"

    print("KERNEL_OK")
</pallas_src>

<mosaic_0001>
module attributes {stable_mosaic.version = 11 : i64} {
  func.func @kernel(%arg0: i32, %arg1: i32, %arg2: memref<2x128xf32, #tpu.memory_space<vmem>>, %arg3: memref<1x128xf32, #tpu.memory_space<vmem>>, %arg4: memref<2x128xf32, #tpu.memory_space<vmem>>) attributes {dimension_semantics = [#tpu.dimension_semantics<parallel>, #tpu.dimension_semantics<parallel>], iteration_bounds = array<i64: 1, 1>, scalar_prefetch = 0 : i64, scratch_operands = 0 : i64, tpu.core_type = #tpu.core_type<tc>, window_params = [{transform_indices = @transform_0, window_bounds = array<i64: 2, 128>}, {pipeline_mode = #tpu.pipeline_mode<synchronous>, transform_indices = @transform_1, window_bounds = array<i64: 1, 128>}, {transform_indices = @transform_2, window_bounds = array<i64: 2, 128>}]} {
    %c0 = arith.constant 0 : index
    %c0_0 = arith.constant 0 : index
    %0 = vector.load %arg3[%c0, %c0_0] : memref<1x128xf32, #tpu.memory_space<vmem>>, vector<1x128xf32>
    %c0_1 = arith.constant 0 : index
    %c0_2 = arith.constant 0 : index
    %1 = vector.load %arg2[%c0_1, %c0_2] : memref<2x128xf32, #tpu.memory_space<vmem>>, vector<2x128xf32>
    %2 = vector.broadcast %0 : vector<1x128xf32> to vector<2x128xf32>
    %3 = arith.addf %1, %2 : vector<2x128xf32>
    %c0_3 = arith.constant 0 : index
    %c0_4 = arith.constant 0 : index
    %4 = vector.load %arg4[%c0_3, %c0_4] : memref<2x128xf32, #tpu.memory_space<vmem>>, vector<2x128xf32>
    tpu.vector_store %arg4[%c0_3, %c0_4], %3 {strides = array<i32>} : memref<2x128xf32, #tpu.memory_space<vmem>>, vector<2x128xf32>,
    return
  }
  func.func @transform_0(%arg0: i32, %arg1: i32) -> (i32, i32) {
    %c0_i32 = arith.constant 0 : i32
    return %arg0, %arg1 : i32, i32
  }
  func.func @transform_1(%arg0: i32, %arg1: i32) -> (i32, i32) {
    %c0_i32 = arith.constant 0 : i32
    %c0_i32_0 = arith.constant 0 : i32
    %c0_i32_1 = arith.constant 0 : i32
    return %c0_i32, %c0_i32_0 : i32, i32
  }
  func.func @transform_2(%arg0: i32, %arg1: i32) -> (i32, i32) {
    %c0_i32 = arith.constant 0 : i32
    return %arg0, %arg1 : i32, i32
  }
}

</mosaic_0001>

<bundles_post_ra>
// kernel: tpu_custom_call.1
= control target key start
LH: loop header
LB: loop body
LE: loop exit
PB: predicated region body
PF: predicated region fallthrough
CT: control target
= control target key end

     0   :  { %7 = vsyncpa [#allocation3], 0  ;;  %s122_s0 = inlined_call_operand.hbm [shape: f32[2,128], index: 0, kind: input, shape index: {}]   ;;  %s123_s1 = inlined_call_operand.vmem [shape: f32[1,128], index: 1, kind: input, shape index: {}]   ;;  %s124_s2 = inlined_call_operand.hbm [shape: f32[2,128], index: 2, kind: output, shape index: {}]  }
   0x1   :  { %8 = vsyncpa [#allocation4], 0  ;;  %s96_s9 = smov [#allocation2]  }
   0x2   :  { %s15_s10 = sshll.u32 %s96_s9, 4  ;;  %s16_s10 = int_to_ptr.vmem [resolvable:$true] %s15_s10 }
   0x3   :  { %s60_s11 = scalar_lea.vmem %s16_s10, 32  ;;  %p65_p1 = scmp.lt.s32.totalorder %s16_s10, %s16_s10 }
   0x4   :  { %p61_p0 = scmp.ne.s32.totalorder %s16_s10, %s60_s11  ;;  %p66_p2 = scmp.lt.s32.totalorder %s60_s11, %s60_s11 }
   0x6   :  { %p67_p3 = por %p66_p2, %p65_p1 }
   0x8   :  { %p68_p4 = pnand %p67_p3, %p61_p0 }
   0xa   :  { %71 = shalt.err (!%p68_p4)
}
   0xb   :  { %18 = dma.hbm_to_vmem [thread:$0]  %s122_s0, 32, %s16_s10, [#allocation3]  }
   0xc   :  { %92 = dma.done.wait [#allocation3], 32  }
   0xd   :  { %93 = vsyncadd [#allocation3], 4294967264  ;;  %s97_s14 = smov [#allocation5]   ;;  %v49_v0 = vld [vmem:[%s123_s1] ss:$0 sm:$0xff] }
   0xe   :  { %s40_s15 = sshll.u32 %s97_s14, 4  ;;  %v25_v1 = vld [vmem:[#allocation2] sm:$0x3]  ;;  %s41_s15 = int_to_ptr.vmem [resolvable:$true] %s40_s15 }
   0xf   :  { %v32_v2 = vadd.f32 %v49_v0, %v25_v1  ;;  %s72_s18 = scalar_lea.vmem %s41_s15, 32  ;;  %p77_p6 = scmp.lt.s32.totalorder %s41_s15, %s41_s15 }
  0x10   :  { %p73_p5 = scmp.ne.s32.totalorder %s41_s15, %s72_s18  ;;  %p78_p7 = scmp.lt.s32.totalorder %s72_s18, %s72_s18 }
  0x11   :  { %33 = vst [vmem:[#allocation5] sm:$0x3] %v32_v2 }
  0x12   :  { %p79_p8 = por %p78_p7, %p77_p6 }
  0x14   :  { %p80_p9 = pnand %p79_p8, %p73_p5 }
  0x16   :  { %83 = shalt.err (!%p80_p9)
}
  0x17   :  { %43 = dma.vmem_to_hbm [thread:$0]  %s41_s15, 32, %s124_s2, [#allocation4]  }
  0x18   :  { %94 = dma.done.wait [#allocation4], 32  }
  0x19   :  { %95 = vsyncadd [#allocation4], 4294967264 }
  0x1a   :  { %47 = vsyncpa [#allocation3], 1 }
  0x1b   :  { %48 = vsyncpa [#allocation4], 1 }

</bundles_post_ra>
